<compile_context>
chip_gen: v6e
topology: v6e:2x2x1
jax: 0.10.0
libtpu: 0.0.40
codegen_flags: <defaults>
</compile_context>

<pallas_src>
import functools

import jax
import jax.numpy as jnp
import numpy as np
from jax.experimental import pallas as pl
from jax.experimental.pallas import tpu as pltpu

EPS = 1e-5


def _vmem_capacity_bytes():
    try:
        cap = getattr(pltpu.get_tpu_info(), "vmem_capacity_bytes", None)
        if cap:
            return int(cap)
    except Exception:
        pass
    return 64 * 1024 * 1024  # conservative default (v7x per-core VMEM)


def _budgets():
    vmem = _vmem_capacity_bytes()
    block_cap = max(vmem // 8, 2 << 20)          # ~8 MiB (v7x) / ~16 MiB (v5e/v6e)
    vmem_limit = min(vmem * 3 // 4, 6 * block_cap)
    return block_cap, vmem_limit


def _pick_c_tile(C, N, HW, block_cap):
    """Channel tile that (a) exactly divides C, (b) is a multiple of 8 (or the
    full C), (c) fits the per-block VMEM budget and (d) leaves >= 4 grid steps
    when possible (2 per v7x TensorCore).  Returns None if not even an
    8-channel full-spatial block fits -> caller uses the two-pass path."""
    row_bytes = N * HW * 4
    max_rows = block_cap // max(row_bytes, 1)
    divisors = [d for d in range(8, C + 1, 8) if C % d == 0]
    fitting = [d for d in divisors if d <= max_rows]
    if fitting:
        preferred = [d for d in fitting if C // d >= 4]
        return max(preferred) if preferred else max(fitting)
    if not divisors and C * row_bytes <= block_cap:
        return C  # e.g. C=4: the whole (tiny) array is a single block
    return None


# ---------------------------------------------------------------------------
# Single-pass path: the full (N, c_tile, HW) slab is resident in VMEM, so the
# moments and the fused affine are computed in one sweep (1 read + 1 write).
# ---------------------------------------------------------------------------
def _bn_single_pass_kernel(x_ref, g_ref, b_ref, o_ref, *, inv_count):
    # x_ref/o_ref: (N, c_tile, HW) f32;  g_ref/b_ref: (1, c_tile, 1) f32
    x = x_ref[...]
    # Lane-axis reduce first (XLU), then the small batch axis (VPU adds).
    s = jnp.sum(jnp.sum(x, axis=2, keepdims=True), axis=0, keepdims=True)
    ss = jnp.sum(jnp.sum(x * x, axis=2, keepdims=True), axis=0, keepdims=True)
    mean = s * inv_count                                    # (1, c_tile, 1)
    # Biased variance (PyTorch train-mode normalization); clamp tiny negatives
    # from E[x^2]-mean^2 cancellation.
    var = jnp.maximum(ss * inv_count - mean * mean, 0.0)
    inv_std = jax.lax.rsqrt(var + EPS)
    scale = g_ref[...] * inv_std                            # (1, c_tile, 1)
    shift = b_ref[...] - mean * scale
    o_ref[...] = x * scale + shift                          # 2 VPU ops / element


def _bn_single_pass(x3, gamma, beta, c_tile, vmem_limit):
    N, C, HW = x3.shape
    g3 = gamma.reshape(1, C, 1).astype(jnp.float32)
    b3 = beta.reshape(1, C, 1).astype(jnp.float32)
    kernel = functools.partial(_bn_single_pass_kernel, inv_count=1.0 / float(N * HW))
    return pl.pallas_call(
        kernel,
        out_shape=jax.ShapeDtypeStruct((N, C, HW), jnp.float32),
        grid_spec=pltpu.PrefetchScalarGridSpec(
            num_scalar_prefetch=0,
            grid=(C // c_tile,),
            in_specs=[
                pl.BlockSpec((N, c_tile, HW), lambda i: (0, i, 0)),
                pl.BlockSpec((1, c_tile, 1), lambda i: (0, i, 0)),
                pl.BlockSpec((1, c_tile, 1), lambda i: (0, i, 0)),
            ],
            out_specs=pl.BlockSpec((N, c_tile, HW), lambda i: (0, i, 0)),
        ),
        compiler_params=pltpu.CompilerParams(
            dimension_semantics=("parallel",),
            vmem_limit_bytes=vmem_limit,
        ),
    )(x3, g3, b3)


# ---------------------------------------------------------------------------
# Two-pass fallback for large N*H*W (full-spatial block would not fit VMEM):
# pass 1 accumulates per-channel sum / sum-of-squares over spatial tiles into
# VMEM scratch; pass 2 applies the fused affine.
# ---------------------------------------------------------------------------
def _bn_stats_kernel(x_ref, mean_ref, istd_ref, s_acc, ss_acc, *,
                     inv_count, hw, hw_tile):
    j = pl.program_id(1)

    @pl.when(j == 0)
    def _init():
        s_acc[...] = jnp.zeros_like(s_acc)
        ss_acc[...] = jnp.zeros_like(ss_acc)

    x = x_ref[...]                                          # (N, c_tile, hw_tile)
    lane = jax.lax.broadcasted_iota(jnp.int32, x.shape, 2)
    x = jnp.where(j * hw_tile + lane < hw, x, 0.0)          # mask spatial remainder
    s_acc[...] += jnp.sum(jnp.sum(x, axis=2, keepdims=True), axis=0, keepdims=True)
    ss_acc[...] += jnp.sum(jnp.sum(x * x, axis=2, keepdims=True), axis=0, keepdims=True)

    @pl.when(j == pl.num_programs(1) - 1)
    def _finalize():
        mean = s_acc[...] * inv_count
        var = jnp.maximum(ss_acc[...] * inv_count - mean * mean, 0.0)
        mean_ref[...] = mean
        istd_ref[...] = jax.lax.rsqrt(var + EPS)


def _bn_apply_kernel(x_ref, scale_ref, shift_ref, o_ref):
    o_ref[...] = x_ref[...] * scale_ref[...] + shift_ref[...]


def _bn_two_pass(x3, gamma, beta, block_cap, vmem_limit):
    N, C, HW = x3.shape
    c_tile = 8 if C >= 8 else C
    if HW <= 128:
        hw_tile = HW
    else:
        hw_tile = max(128, (block_cap // max(N * c_tile * 4, 1)) // 128 * 128)
        hw_tile = min(hw_tile, (HW // 128) * 128)
    grid = (pl.cdiv(C, c_tile), pl.cdiv(HW, hw_tile))

    stats_kernel = functools.partial(
        _bn_stats_kernel, inv_count=1.0 / float(N * HW), hw=HW, hw_tile=hw_tile)
    mean, istd = pl.pallas_call(
        stats_kernel,
        out_shape=(jax.ShapeDtypeStruct((1, C, 1), jnp.float32),
                   jax.ShapeDtypeStruct((1, C, 1), jnp.float32)),
        grid_spec=pltpu.PrefetchScalarGridSpec(
            num_scalar_prefetch=0,
            grid=grid,
            in_specs=[pl.BlockSpec((N, c_tile, hw_tile), lambda i, j: (0, i, j))],
            out_specs=(pl.BlockSpec((1, c_tile, 1), lambda i, j: (0, i, 0)),
                       pl.BlockSpec((1, c_tile, 1), lambda i, j: (0, i, 0))),
            scratch_shapes=[pltpu.VMEM((1, c_tile, 1), jnp.float32),
                            pltpu.VMEM((1, c_tile, 1), jnp.float32)],
        ),
        compiler_params=pltpu.CompilerParams(
            dimension_semantics=("parallel", "arbitrary"),
            vmem_limit_bytes=vmem_limit,
        ),
    )(x3)

    scale = gamma.reshape(1, C, 1).astype(jnp.float32) * istd
    shift = beta.reshape(1, C, 1).astype(jnp.float32) - mean * scale

    return pl.pallas_call(
        _bn_apply_kernel,
        out_shape=jax.ShapeDtypeStruct((N, C, HW), jnp.float32),
        grid_spec=pltpu.PrefetchScalarGridSpec(
            num_scalar_prefetch=0,
            grid=grid,
            in_specs=[
                pl.BlockSpec((N, c_tile, hw_tile), lambda i, j: (0, i, j)),
                pl.BlockSpec((1, c_tile, 1), lambda i, j: (0, i, 0)),
                pl.BlockSpec((1, c_tile, 1), lambda i, j: (0, i, 0)),
            ],
            out_specs=pl.BlockSpec((N, c_tile, hw_tile), lambda i, j: (0, i, j)),
        ),
        compiler_params=pltpu.CompilerParams(
            dimension_semantics=("parallel", "parallel"),
            vmem_limit_bytes=vmem_limit,
        ),
    )(x3, scale, shift)


@jax.jit
def batchnorm2d(x_nchw, gamma, beta):
    """Training-mode BatchNorm2d forward. x_nchw: (N, C, H, W) -> (N, C, H, W)."""
    N, C, H, W = x_nchw.shape
    HW = H * W

    # Contiguous (free) reshape -- no transpose, no extra HBM pass.
    x3 = x_nchw.reshape(N, C, HW)
    if x3.dtype != jnp.float32:
        x3 = x3.astype(jnp.float32)

    block_cap, vmem_limit = _budgets()
    c_tile = _pick_c_tile(C, N, HW, block_cap)
    if c_tile is not None:
        out = _bn_single_pass(x3, gamma, beta, c_tile, vmem_limit)
    else:
        out = _bn_two_pass(x3, gamma, beta, block_cap, vmem_limit)
    return out.reshape(N, C, H, W).astype(x_nchw.dtype)


def _reference(x, gamma, beta):
    mean = jnp.mean(x, axis=(0, 2, 3), keepdims=True)
    var = jnp.var(x, axis=(0, 2, 3), keepdims=True)   # biased, train-mode normalization
    g = gamma.reshape(1, -1, 1, 1)
    b = beta.reshape(1, -1, 1, 1)
    return (x - mean) * jax.lax.rsqrt(var + EPS) * g + b


def _check(N, C, H, W, key):
    kx, kg, kb = jax.random.split(key, 3)
    x = jax.random.normal(kx, (N, C, H, W), dtype=jnp.float32)
    gamma = 1.0 + 0.1 * jax.random.normal(kg, (C,), dtype=jnp.float32)
    beta = 0.1 * jax.random.normal(kb, (C,), dtype=jnp.float32)
    y = batchnorm2d(x, gamma, beta)
    jax.block_until_ready(y)
    np.testing.assert_allclose(
        np.asarray(y), np.asarray(_reference(x, gamma, beta)), rtol=1e-4, atol=1e-5)


if __name__ == "__main__":
    key = jax.random.PRNGKey(0)
    k1, k2 = jax.random.split(key)
    # Small shape consistent with the module's NCHW BatchNorm2d input.
    _check(2, 4, 16, 16, k1)
    # Small multi-block shape exercising the divisor-of-C channel tiling (grid=4).
    _check(1, 32, 16, 16, k2)
    print("KERNEL_OK")
</pallas_src>

<mosaic_0001>
module attributes {stable_mosaic.version = 11 : i64} {
  func.func @_bn_single_pass_kernel(%arg0: i32, %arg1: memref<2x4x256xf32, #tpu.memory_space<vmem>>, %arg2: memref<1x4x1xf32, #tpu.memory_space<vmem>>, %arg3: memref<1x4x1xf32, #tpu.memory_space<vmem>>, %arg4: memref<2x4x256xf32, #tpu.memory_space<vmem>>) attributes {dimension_semantics = [#tpu.dimension_semantics<parallel>], iteration_bounds = array<i64: 1>, scalar_prefetch = 0 : i64, scratch_operands = 0 : i64, tpu.core_type = #tpu.core_type<tc>, window_params = [{transform_indices = @transform_0, window_bounds = array<i64: 2, 4, 256>}, {transform_indices = @transform_1, window_bounds = array<i64: 1, 4, 1>}, {transform_indices = @transform_2, window_bounds = array<i64: 1, 4, 1>}, {transform_indices = @transform_3, window_bounds = array<i64: 2, 4, 256>}]} {
    %c0 = arith.constant 0 : index
    %c0_0 = arith.constant 0 : index
    %c0_1 = arith.constant 0 : index
    %0 = vector.load %arg1[%c0, %c0_0, %c0_1] : memref<2x4x256xf32, #tpu.memory_space<vmem>>, vector<2x4x256xf32>
    %cst = arith.constant dense<0.000000e+00> : vector<2x4xf32>
    %1 = vector.multi_reduction <add>, %0, %cst [2] : vector<2x4x256xf32> to vector<2x4xf32>
    %2 = vector.shape_cast %1 : vector<2x4xf32> to vector<2x4x1xf32>
    %cst_2 = arith.constant dense<0.000000e+00> : vector<4x1xf32>
    %3 = vector.multi_reduction <add>, %2, %cst_2 [0] : vector<2x4x1xf32> to vector<4x1xf32>
    %4 = vector.shape_cast %3 : vector<4x1xf32> to vector<1x4x1xf32>
    %5 = arith.mulf %0, %0 : vector<2x4x256xf32>
    %cst_3 = arith.constant dense<0.000000e+00> : vector<2x4xf32>
    %6 = vector.multi_reduction <add>, %5, %cst_3 [2] : vector<2x4x256xf32> to vector<2x4xf32>
    %7 = vector.shape_cast %6 : vector<2x4xf32> to vector<2x4x1xf32>
    %cst_4 = arith.constant dense<0.000000e+00> : vector<4x1xf32>
    %8 = vector.multi_reduction <add>, %7, %cst_4 [0] : vector<2x4x1xf32> to vector<4x1xf32>
    %9 = vector.shape_cast %8 : vector<4x1xf32> to vector<1x4x1xf32>
    %cst_5 = arith.constant 0.001953125 : f32
    %10 = vector.broadcast %cst_5 : f32 to vector<1x4x1xf32>
    %11 = arith.mulf %4, %10 : vector<1x4x1xf32>
    %cst_6 = arith.constant 0.001953125 : f32
    %12 = vector.broadcast %cst_6 : f32 to vector<1x4x1xf32>
    %13 = arith.mulf %9, %12 : vector<1x4x1xf32>
    %14 = arith.mulf %11, %11 : vector<1x4x1xf32>
    %15 = arith.subf %13, %14 : vector<1x4x1xf32>
    %cst_7 = arith.constant 0.000000e+00 : f32
    %16 = vector.broadcast %cst_7 : f32 to vector<1x4x1xf32>
    %17 = arith.maximumf %15, %16 : vector<1x4x1xf32>
    %cst_8 = arith.constant 9.99999974E-6 : f32
    %18 = vector.broadcast %cst_8 : f32 to vector<1x4x1xf32>
    %19 = arith.addf %17, %18 : vector<1x4x1xf32>
    %20 = math.rsqrt %19 : vector<1x4x1xf32>
    %c0_9 = arith.constant 0 : index
    %c0_10 = arith.constant 0 : index
    %c0_11 = arith.constant 0 : index
    %21 = vector.load %arg2[%c0_9, %c0_10, %c0_11] : memref<1x4x1xf32, #tpu.memory_space<vmem>>, vector<1x4x1xf32>
    %22 = arith.mulf %21, %20 : vector<1x4x1xf32>
    %c0_12 = arith.constant 0 : index
    %c0_13 = arith.constant 0 : index
    %c0_14 = arith.constant 0 : index
    %23 = vector.load %arg3[%c0_12, %c0_13, %c0_14] : memref<1x4x1xf32, #tpu.memory_space<vmem>>, vector<1x4x1xf32>
    %24 = arith.mulf %11, %22 : vector<1x4x1xf32>
    %25 = arith.subf %23, %24 : vector<1x4x1xf32>
    %26 = vector.broadcast %22 : vector<1x4x1xf32> to vector<2x4x256xf32>
    %27 = arith.mulf %0, %26 : vector<2x4x256xf32>
    %28 = vector.broadcast %25 : vector<1x4x1xf32> to vector<2x4x256xf32>
    %29 = arith.addf %27, %28 : vector<2x4x256xf32>
    %c0_15 = arith.constant 0 : index
    %c0_16 = arith.constant 0 : index
    %c0_17 = arith.constant 0 : index
    %30 = vector.load %arg4[%c0_15, %c0_16, %c0_17] : memref<2x4x256xf32, #tpu.memory_space<vmem>>, vector<2x4x256xf32>
    tpu.vector_store %arg4[%c0_15, %c0_16, %c0_17], %29 {strides = array<i32>} : memref<2x4x256xf32, #tpu.memory_space<vmem>>, vector<2x4x256xf32>,
    return
  }
  func.func @transform_0(%arg0: i32) -> (i32, i32, i32) {
    %c0_i32 = arith.constant 0 : i32
    %c0_i32_0 = arith.constant 0 : i32
    %c0_i32_1 = arith.constant 0 : i32
    return %c0_i32, %arg0, %c0_i32_0 : i32, i32, i32
  }
  func.func @transform_1(%arg0: i32) -> (i32, i32, i32) {
    %c0_i32 = arith.constant 0 : i32
    %c0_i32_0 = arith.constant 0 : i32
    %c0_i32_1 = arith.constant 0 : i32
    return %c0_i32, %arg0, %c0_i32_0 : i32, i32, i32
  }
  func.func @transform_2(%arg0: i32) -> (i32, i32, i32) {
    %c0_i32 = arith.constant 0 : i32
    %c0_i32_0 = arith.constant 0 : i32
    %c0_i32_1 = arith.constant 0 : i32
    return %c0_i32, %arg0, %c0_i32_0 : i32, i32, i32
  }
  func.func @transform_3(%arg0: i32) -> (i32, i32, i32) {
    %c0_i32 = arith.constant 0 : i32
    %c0_i32_0 = arith.constant 0 : i32
    %c0_i32_1 = arith.constant 0 : i32
    return %c0_i32, %arg0, %c0_i32_0 : i32, i32, i32
  }
}

</mosaic_0001>

<bundles_post_ra>
// kernel: batchnorm2d.1
= control target key start
LH: loop header
LB: loop body
LE: loop exit
PB: predicated region body
PF: predicated region fallthrough
CT: control target
= control target key end

     0   :  { %vm22_vm0 = vcmask 1043456   ;;  %v111_v20 = vmov 0   ;;  %v112_v43 = vmov 839922192   ;;  %v76_v45 = vlaneseq  ;;  %s179_s0 = inlined_call_operand.vmem [shape: f32[2,4,256], index: 0, kind: input, shape index: {}]   ;;  %s180_s1 = inlined_call_operand.vmem [shape: f32[1,4,1], index: 1, kind: input, shape index: {}]   ;;  %s181_s2 = inlined_call_operand.vmem [shape: f32[1,4,1], index: 2, kind: input, shape index: {}]   ;;  %s182_s3 = inlined_call_operand.vmem [shape: f32[2,4,256], index: 3, kind: output, shape index: {}]  }
   0x1   :  { %v136_v0 = vld [vmem:[%s179_s0] sm:$0xff]  ;;  %v141_v1 = vld [vmem:[%s179_s0 + $0x8] sm:$0xff]  ;;  %105 = vset.pattern.permute.xlu0 %v111_v20  ;;  %106 = vset.pattern.permute.xlu1 %v111_v20  ;;  %v74_v44 = vunpack.c.l.s4 %v112_v43 }
   0x2   :  { %v18_v2 = vcombine.high %v136_v0, %v136_v0  ;;  %v23_v3 = vsel %vm22_vm0, %v136_v0, 0.0  ;;  %v36_v4 = vmul.f32 %v136_v0, %v136_v0  ;;  %v19_v5 = vcombine.high %v141_v1, %v141_v1  ;;  %v64_v37 = vld [vmem:[%s180_s1] sm:$0xf] }
   0x3   :  { %v28_v6 = vsel %vm22_vm0, %v141_v1, 0.0  ;;  %v37_v7 = vmul.f32 %v141_v1, %v141_v1  ;;  %v66_v40 = vld [vmem:[%s181_s2] sm:$0xf]  ;;  %v75_v46 = vunpack.c.0.s8 %v74_v44  ;;  %v77_v47 = vshrl.u32 %v76_v45, 7 }
   0x4   :  { %v24_v8 = vsel %vm22_vm0, %v18_v2, 0.0  ;;  %v40_v9 = vcombine.high %v36_v4, %v36_v4  ;;  %v44_v10 = vsel %vm22_vm0, %v36_v4, 0.0  ;;  %v29_v11 = vsel %vm22_vm0, %v19_v5, 0.0 }
   0x5   :  { %v25_v12 = vadd.f32 %v24_v8, %v23_v3  ;;  %v41_v13 = vcombine.high %v37_v7, %v37_v7  ;;  %v49_v15 = vsel %vm22_vm0, %v37_v7, 0.0  ;;  %v30_v17 = vadd.f32 %v29_v11, %v28_v6 }
   0x6   :  { %v45_v14 = vsel %vm22_vm0, %v40_v9, 0.0  ;;  %v78_v48 = vsub.s32 %v75_v46, %v77_v47 }
   0x7   :  { %26 = vadd.xlane.f32.xlu0 %v25_v12  ;;  %v46_v16 = vadd.f32 %v45_v14, %v44_v10  ;;  %v50_v18 = vsel %vm22_vm0, %v41_v13, 0.0 }
   0x8   :  { %v51_v19 = vadd.f32 %v50_v18, %v49_v15 }
   0x9   :  { %47 = vadd.xlane.f32.xlu1 %v46_v16 }
   0xb   :  { %31 = vadd.xlane.f32.xlu0 %v30_v17 }
   0xd   :  { %52 = vadd.xlane.f32.xlu1 %v51_v19 }
  0x90   :  { %v27_v21 = vpop.xlane.xlu0 %26 }
  0x91   :  { %v33_v24 = vsel %vm22_vm0, %v27_v21, 0.0 }
  0x92   :  { %v48_v22 = vpop.xlane.xlu1 %47 }
  0x93   :  { %v54_v28 = vsel %vm22_vm0, %v48_v22, 0.0 }
  0x94   :  { %v32_v23 = vpop.xlane.xlu0 %31 }
  0x95   :  { %v34_v25 = vsel %vm22_vm0, %v32_v23, 0.0 }
  0x96   :  { %v35_v26 = vadd.f32 %v34_v25, %v33_v24  ;;  %v53_v27 = vpop.xlane.xlu1 %52 }
  0x97   :  { %v55_v29 = vsel %vm22_vm0, %v53_v27, 0.0 }
  0x98   :  { %v57_v30 = vmul.f32 0.001953125, %v35_v26  ;;  %v56_v31 = vadd.f32 %v55_v29, %v54_v28 }
  0x9a   :  { %v59_v32 = vmul.f32 %v57_v30, %v57_v30  ;;  %v58_v33 = vmul.f32 0.001953125, %v56_v31 }
  0x9c   :  { %v60_v34 = vsub.f32 %v58_v33, %v59_v32 }
  0x9e   :  { %v61_v35 = vmax.f32 %v60_v34, 0.0 }
  0xa0   :  { %v62_v36 = vadd.f32 1e-05, %v61_v35 }
  0xa2   :  { %109 = vrsqrt.f32 %v62_v36 }
  0xaf   :  { %v110_v38 = vpop.eup %109 }
  0xb0   :  { %v65_v39 = vmul.f32 %v110_v38, %v64_v37 }
  0xb2   :  { %71 = vperm.xlu0 %105, %v65_v39   ;;  %v67_v41 = vmul.f32 %v65_v39, %v57_v30 }
  0xb4   :  { %v68_v42 = vsub.f32 %v66_v40, %v67_v41 }
  0xb6   :  { %85 = vperm.xlu1 %106, %v68_v42  }
 0x12d   :  { %v72_v49 = vpop.permute.xlu0 %71 }
 0x12e   :  { %v79_v50 = vrot.slane %v72_v49, %v78_v48 }
 0x130   :  { %v81_v52 = vmul.f32 %v79_v50, %v136_v0  ;;  %v82_v53 = vmul.f32 %v79_v50, %v141_v1 }
 0x131   :  { %v86_v51 = vpop.permute.xlu1 %85 }
 0x132   :  { %v93_v54 = vrot.slane %v86_v51, %v78_v48 }
 0x134   :  { %v95_v55 = vadd.f32 %v93_v54, %v81_v52  ;;  %v96_v56 = vadd.f32 %v93_v54, %v82_v53 }
 0x136   :  { %97 = vst [vmem:[%s182_s3] sm:$0xff] %v95_v55  ;;  %98 = vst [vmem:[%s182_s3 + $0x8] sm:$0xff] %v96_v56 }

</bundles_post_ra>
